<compile_context>
chip_gen: v6e
topology: v6e:2x2x1
jax: 0.10.0
libtpu: 0.0.40
codegen_flags: <defaults>
</compile_context>

<pallas_src>
import functools

import jax
import jax.numpy as jnp
from jax.experimental import pallas as pl
from jax.experimental.pallas import tpu as pltpu

_LANE = 128                     # TPU lane width (pad target; use 256 for wide layers on v6e/v7x)
_VMEM_BUDGET = 48 * 1024 * 1024  # conservative residency budget (v7x has 64 MiB / TensorCore)


def _round_up(x: int, m: int) -> int:
    return ((x + m - 1) // m) * m


def _fused_mlp_kernel(*refs, num_layers: int, compute_dtype, epilogue_dtype):
    """Fused MLP on one batch tile.

    refs = (x_ref, w0_ref, b0_ref, w1_ref, b1_ref, ..., o_ref)
      x_ref : (TB, Din_pad)            activation tile (f32 in HBM)
      wl_ref: (Din_l_pad, Dout_l_pad)  resident weight (already in compute_dtype)
      bl_ref: (1, Dout_l_pad)          resident bias (f32)
      o_ref : (TB, Dout_last_pad)      lane-dense output tile
    Intermediates stay in vregs / VMEM spill; no HBM traffic between layers.
    """
    x_ref = refs[0]
    o_ref = refs[-1]

    h = x_ref[...].astype(compute_dtype)           # single cast straight to MXU dtype
    for layer in range(num_layers):
        w = refs[1 + 2 * layer][...]
        b = refs[2 + 2 * layer][...]
        # MXU matmul: operands in compute_dtype (bf16 default), f32 accumulation.
        y = jnp.dot(h.astype(compute_dtype), w.astype(compute_dtype),
                    preferred_element_type=jnp.float32)
        # Epilogue in epilogue_dtype (bf16 on v6e/v7x; pass f32 for v5e).
        y = y.astype(epilogue_dtype) + b.astype(epilogue_dtype)
        if layer < num_layers - 1:
            y = jnp.maximum(y, 0.0)
        h = y
    o_ref[...] = h.astype(o_ref.dtype)


def init_vanilla_qnetwork_params(key, state_size, action_size, hidden_layers):
    """Deterministic init mimicking nn.Linear default U(-1/sqrt(fan_in), +1/sqrt(fan_in)).
    Stored as (in, out) weight + (1, out) bias, f32."""
    layer_sizes = [state_size] + list(hidden_layers) + [action_size]
    params = []
    for d_in, d_out in zip(layer_sizes[:-1], layer_sizes[1:]):
        key, kw, kb = jax.random.split(key, 3)
        bound = 1.0 / jnp.sqrt(jnp.float32(d_in))
        w = jax.random.uniform(kw, (d_in, d_out), jnp.float32, -bound, bound)
        b = jax.random.uniform(kb, (1, d_out), jnp.float32, -bound, bound)
        params.append((w, b))
    return params


def prepare_params(params, *, compute_dtype=jnp.bfloat16, pad_to=_LANE):
    """One-time prep: zero-pad every feature dim (including the first layer's
    in-features) to a multiple of `pad_to` lanes so all in-kernel loads, matmuls and
    stores are lane-dense, then cast weights to the compute dtype.  Zero rows/cols
    contribute nothing, so results are unchanged.
    (On v6e/v7x with genuinely wide hidden layers, pad_to=256 fills the 256x256 MXU.)"""
    prepared = []
    prev_width = _round_up(params[0][0].shape[0], pad_to)
    for (w, b) in params:
        d_in, d_out = w.shape
        d_out_p = _round_up(d_out, pad_to)
        w_p = jnp.zeros((prev_width, d_out_p), jnp.float32).at[:d_in, :d_out].set(w)
        b_p = jnp.zeros((1, d_out_p), jnp.float32).at[:, :d_out].set(b)
        prepared.append((w_p.astype(compute_dtype), b_p))
        prev_width = d_out_p
    return prepared


def _vmem_estimate(tb, d_in_pad, d_out_pad, prepared):
    """Rough scoped-VMEM need: weights (counted double-buffered to stay conservative
    in case single-buffering is unavailable) + pipelined in/out tiles + activation
    spill allowance (intermediates larger than the vreg file spill to VMEM)."""
    w_bytes = 2 * sum(w.size * w.dtype.itemsize + b.size * b.dtype.itemsize
                      for w, b in prepared)
    act_w = max(max(w.shape[0], w.shape[1]) for w, _ in prepared)
    in_bytes = 2 * tb * d_in_pad * 4       # input stays f32, double-buffered
    out_bytes = 2 * tb * d_out_pad * 4     # f32 output, double-buffered
    spill = 3 * tb * act_w * 4             # activation spill headroom
    return w_bytes + in_bytes + out_bytes + spill


def vanilla_qnetwork_forward(prepared_params, state, action_size, *,
                             batch_tile=512, compute_dtype=jnp.bfloat16,
                             epilogue_dtype=None):
    """Single fused pallas_call over a batch-tiled "parallel" grid.

    Defaults target v6e/v7x: bf16 MXU operands + bf16 epilogue.  For v5e use
    epilogue_dtype=jnp.float32 (no bf16 VPU); bf16 weights/dots are still fine there.
    """
    if epilogue_dtype is None:
        epilogue_dtype = compute_dtype

    B, d_in = state.shape
    num_layers = len(prepared_params)
    d_in_pad = prepared_params[0][0].shape[0]
    d_out_pad = prepared_params[-1][0].shape[1]

    # ---- batch tiling -----------------------------------------------------------
    b8 = _round_up(B, 8)
    tb = min(_round_up(batch_tile, 8), b8)
    # Ensure >= 2 grid steps when the batch allows it, so v7x megacore uses both TCs.
    if b8 >= 16 and pl.cdiv(b8, tb) < 2:
        tb = _round_up(pl.cdiv(b8, 2), 8)
    # Shrink the batch tile if the VMEM estimate exceeds the residency budget.
    # TODO(synk): if the weights ALONE exceed the budget (huge hidden layers), full
    # weight residency is impossible and a K/N tiling grid axis would be needed.
    while _vmem_estimate(tb, d_in_pad, d_out_pad, prepared_params) > _VMEM_BUDGET and tb > 8:
        tb = max(8, _round_up(tb // 2, 8))
    b_pad = _round_up(B, tb)

    # ---- pad input once: (b_pad, d_in_pad) -> lane-dense layer-0 load ------------
    x = state
    if (b_pad, d_in_pad) != (B, d_in):
        x = jnp.pad(state, ((0, b_pad - B), (0, d_in_pad - d_in)))

    flat_wb = []
    for (w, b) in prepared_params:
        flat_wb.extend((w, b))

    vmem_est = _vmem_estimate(tb, d_in_pad, d_out_pad, prepared_params)
    vmem_limit = int(min(max(1.5 * vmem_est + (4 << 20), 32 << 20), 64 << 20))

    kernel = functools.partial(_fused_mlp_kernel,
                               num_layers=num_layers,
                               compute_dtype=compute_dtype,
                               epilogue_dtype=epilogue_dtype)

    def run(single_buffer_weights):
        in_specs = [pl.BlockSpec((tb, d_in_pad), lambda i: (i, 0))]  # activation tile
        for (w, b) in prepared_params:
            if single_buffer_weights:
                # Constant index_map -> block never changes; single buffer saves VMEM.
                in_specs.append(pl.BlockSpec(w.shape, lambda i: (0, 0),
                                             pipeline_mode=pl.Buffered(1)))
                in_specs.append(pl.BlockSpec(b.shape, lambda i: (0, 0),
                                             pipeline_mode=pl.Buffered(1)))
            else:
                in_specs.append(pl.BlockSpec(w.shape, lambda i: (0, 0)))
                in_specs.append(pl.BlockSpec(b.shape, lambda i: (0, 0)))
        out = pl.pallas_call(
            kernel,
            out_shape=jax.ShapeDtypeStruct((b_pad, d_out_pad), jnp.float32),
            grid=(b_pad // tb,),
            in_specs=in_specs,
            out_specs=pl.BlockSpec((tb, d_out_pad), lambda i: (i, 0)),
            compiler_params=pltpu.CompilerParams(
                # batch axis is embarrassingly parallel -> megacore sharding on v7x.
                dimension_semantics=("parallel",),
                vmem_limit_bytes=vmem_limit,
            ),
        )(x, *flat_wb)
        return jax.block_until_ready(out)

    try:
        out_padded = run(True)       # preferred: single-buffered resident weights
    except Exception:
        out_padded = run(False)      # fallback: default double buffering

    # Strip batch padding and lane padding of the final layer.
    return out_padded[:B, :action_size]


def _reference_forward(params, state, compute_dtype=jnp.float32, epilogue_dtype=None):
    """Plain-JAX reference with the same cast sequence as the kernel."""
    ep = compute_dtype if epilogue_dtype is None else epilogue_dtype
    x = state.astype(compute_dtype)
    n = len(params)
    for i, (w, b) in enumerate(params):
        y = jnp.dot(x.astype(compute_dtype), w.astype(compute_dtype),
                    preferred_element_type=jnp.float32)
        y = y.astype(ep) + b.astype(ep)
        if i < n - 1:
            y = jnp.maximum(y, 0.0)
        x = y
    return x.astype(jnp.float32)


if __name__ == "__main__":
    # Shapes consistent with the module: state_size=8, hidden=[32, 32], action_size=4.
    state_size, action_size, hidden_layers = 8, 4, [32, 32]

    key = jax.random.PRNGKey(0)
    key, k_in, k_in2 = jax.random.split(key, 3)
    raw_params = init_vanilla_qnetwork_params(key, state_size, action_size, hidden_layers)

    # --- default path: bf16 MXU operands + bf16 epilogue (v6e/v7x recipe) ---------
    state = jax.random.normal(k_in, (2, state_size), jnp.float32)
    params_bf16 = prepare_params(raw_params, compute_dtype=jnp.bfloat16)
    q_bf16 = vanilla_qnetwork_forward(params_bf16, state, action_size)
    jax.block_until_ready(q_bf16)
    ref_bf16 = _reference_forward(raw_params, state, jnp.bfloat16)
    assert q_bf16.shape == (2, action_size)
    assert jnp.allclose(q_bf16, ref_bf16, atol=1e-2, rtol=1e-2)

    # --- larger batch: exercises the >=2-step parallel grid (v7x megacore) --------
    state_big = jax.random.normal(k_in2, (48, state_size), jnp.float32)
    q_big = vanilla_qnetwork_forward(params_bf16, state_big, action_size)
    jax.block_until_ready(q_big)
    ref_big = _reference_forward(raw_params, state_big, jnp.bfloat16)
    assert q_big.shape == (48, action_size)
    assert jnp.allclose(q_big, ref_big, atol=1e-2, rtol=1e-2)

    # --- f32 parity path (exact match with the PyTorch module's math) -------------
    params_f32 = prepare_params(raw_params, compute_dtype=jnp.float32)
    q_f32 = vanilla_qnetwork_forward(params_f32, state, action_size,
                                     compute_dtype=jnp.float32)
    jax.block_until_ready(q_f32)
    ref_f32 = _reference_forward(raw_params, state, jnp.float32)
    assert q_f32.shape == (2, action_size)
    assert jnp.allclose(q_f32, ref_f32, atol=1e-5, rtol=1e-5)

    print("KERNEL_OK")
</pallas_src>

<mosaic_0001>
module attributes {stable_mosaic.version = 11 : i64} {
  func.func @_fused_mlp_kernel(%arg0: i32, %arg1: memref<8x128xf32, #tpu.memory_space<vmem>>, %arg2: memref<128x128xbf16, #tpu.memory_space<vmem>>, %arg3: memref<1x128xf32, #tpu.memory_space<vmem>>, %arg4: memref<128x128xbf16, #tpu.memory_space<vmem>>, %arg5: memref<1x128xf32, #tpu.memory_space<vmem>>, %arg6: memref<128x128xbf16, #tpu.memory_space<vmem>>, %arg7: memref<1x128xf32, #tpu.memory_space<vmem>>, %arg8: memref<8x128xf32, #tpu.memory_space<vmem>>) attributes {dimension_semantics = [#tpu.dimension_semantics<parallel>], iteration_bounds = array<i64: 1>, scalar_prefetch = 0 : i64, scratch_operands = 0 : i64, tpu.core_type = #tpu.core_type<tc>, window_params = [{transform_indices = @transform_0, window_bounds = array<i64: 8, 128>}, {pipeline_mode = #tpu.pipeline_mode<synchronous>, transform_indices = @transform_1, window_bounds = array<i64: 128, 128>}, {pipeline_mode = #tpu.pipeline_mode<synchronous>, transform_indices = @transform_2, window_bounds = array<i64: 1, 128>}, {pipeline_mode = #tpu.pipeline_mode<synchronous>, transform_indices = @transform_3, window_bounds = array<i64: 128, 128>}, {pipeline_mode = #tpu.pipeline_mode<synchronous>, transform_indices = @transform_4, window_bounds = array<i64: 1, 128>}, {pipeline_mode = #tpu.pipeline_mode<synchronous>, transform_indices = @transform_5, window_bounds = array<i64: 128, 128>}, {pipeline_mode = #tpu.pipeline_mode<synchronous>, transform_indices = @transform_6, window_bounds = array<i64: 1, 128>}, {transform_indices = @transform_7, window_bounds = array<i64: 8, 128>}]} {
    %c0 = arith.constant 0 : index
    %c0_0 = arith.constant 0 : index
    %0 = vector.load %arg1[%c0, %c0_0] : memref<8x128xf32, #tpu.memory_space<vmem>>, vector<8x128xf32>
    %1 = arith.truncf %0 : vector<8x128xf32> to vector<8x128xbf16>
    %c0_1 = arith.constant 0 : index
    %c0_2 = arith.constant 0 : index
    %2 = vector.load %arg2[%c0_1, %c0_2] : memref<128x128xbf16, #tpu.memory_space<vmem>>, vector<128x128xbf16>
    %c0_3 = arith.constant 0 : index
    %c0_4 = arith.constant 0 : index
    %3 = vector.load %arg3[%c0_3, %c0_4] : memref<1x128xf32, #tpu.memory_space<vmem>>, vector<1x128xf32>
    %cst = arith.constant dense<0.000000e+00> : vector<8x128xf32>
    %4 = tpu.matmul %1, %2, %cst {dimension_numbers = #tpu.dot_dimension_numbers<[1], [0], [0], [1], [0, 0, 1, 1], [], []>} : vector<8x128xbf16>, vector<128x128xbf16>, vector<8x128xf32> -> vector<8x128xf32>
    %5 = arith.truncf %4 : vector<8x128xf32> to vector<8x128xbf16>
    %6 = arith.truncf %3 : vector<1x128xf32> to vector<1x128xbf16>
    %7 = vector.broadcast %6 : vector<1x128xbf16> to vector<8x128xbf16>
    %8 = arith.addf %5, %7 : vector<8x128xbf16>
    %cst_5 = arith.constant 0.000000e+00 : bf16
    %9 = vector.broadcast %cst_5 : bf16 to vector<8x128xbf16>
    %10 = arith.maximumf %8, %9 : vector<8x128xbf16>
    %c0_6 = arith.constant 0 : index
    %c0_7 = arith.constant 0 : index
    %11 = vector.load %arg4[%c0_6, %c0_7] : memref<128x128xbf16, #tpu.memory_space<vmem>>, vector<128x128xbf16>
    %c0_8 = arith.constant 0 : index
    %c0_9 = arith.constant 0 : index
    %12 = vector.load %arg5[%c0_8, %c0_9] : memref<1x128xf32, #tpu.memory_space<vmem>>, vector<1x128xf32>
    %cst_10 = arith.constant dense<0.000000e+00> : vector<8x128xf32>
    %13 = tpu.matmul %10, %11, %cst_10 {dimension_numbers = #tpu.dot_dimension_numbers<[1], [0], [0], [1], [0, 0, 1, 1], [], []>} : vector<8x128xbf16>, vector<128x128xbf16>, vector<8x128xf32> -> vector<8x128xf32>
    %14 = arith.truncf %13 : vector<8x128xf32> to vector<8x128xbf16>
    %15 = arith.truncf %12 : vector<1x128xf32> to vector<1x128xbf16>
    %16 = vector.broadcast %15 : vector<1x128xbf16> to vector<8x128xbf16>
    %17 = arith.addf %14, %16 : vector<8x128xbf16>
    %cst_11 = arith.constant 0.000000e+00 : bf16
    %18 = vector.broadcast %cst_11 : bf16 to vector<8x128xbf16>
    %19 = arith.maximumf %17, %18 : vector<8x128xbf16>
    %c0_12 = arith.constant 0 : index
    %c0_13 = arith.constant 0 : index
    %20 = vector.load %arg6[%c0_12, %c0_13] : memref<128x128xbf16, #tpu.memory_space<vmem>>, vector<128x128xbf16>
    %c0_14 = arith.constant 0 : index
    %c0_15 = arith.constant 0 : index
    %21 = vector.load %arg7[%c0_14, %c0_15] : memref<1x128xf32, #tpu.memory_space<vmem>>, vector<1x128xf32>
    %cst_16 = arith.constant dense<0.000000e+00> : vector<8x128xf32>
    %22 = tpu.matmul %19, %20, %cst_16 {dimension_numbers = #tpu.dot_dimension_numbers<[1], [0], [0], [1], [0, 0, 1, 1], [], []>} : vector<8x128xbf16>, vector<128x128xbf16>, vector<8x128xf32> -> vector<8x128xf32>
    %23 = arith.truncf %22 : vector<8x128xf32> to vector<8x128xbf16>
    %24 = arith.truncf %21 : vector<1x128xf32> to vector<1x128xbf16>
    %25 = vector.broadcast %24 : vector<1x128xbf16> to vector<8x128xbf16>
    %26 = arith.addf %23, %25 : vector<8x128xbf16>
    %27 = arith.extf %26 : vector<8x128xbf16> to vector<8x128xf32>
    %c0_17 = arith.constant 0 : index
    %c0_18 = arith.constant 0 : index
    %28 = vector.load %arg8[%c0_17, %c0_18] : memref<8x128xf32, #tpu.memory_space<vmem>>, vector<8x128xf32>
    tpu.vector_store %arg8[%c0_17, %c0_18], %27 {strides = array<i32>} : memref<8x128xf32, #tpu.memory_space<vmem>>, vector<8x128xf32>,
    return
  }
  func.func @transform_0(%arg0: i32) -> (i32, i32) {
    %c0_i32 = arith.constant 0 : i32
    %c0_i32_0 = arith.constant 0 : i32
    return %arg0, %c0_i32 : i32, i32
  }
  func.func @transform_1(%arg0: i32) -> (i32, i32) {
    %c0_i32 = arith.constant 0 : i32
    %c0_i32_0 = arith.constant 0 : i32
    %c0_i32_1 = arith.constant 0 : i32
    return %c0_i32, %c0_i32_0 : i32, i32
  }
  func.func @transform_2(%arg0: i32) -> (i32, i32) {
    %c0_i32 = arith.constant 0 : i32
    %c0_i32_0 = arith.constant 0 : i32
    %c0_i32_1 = arith.constant 0 : i32
    return %c0_i32, %c0_i32_0 : i32, i32
  }
  func.func @transform_3(%arg0: i32) -> (i32, i32) {
    %c0_i32 = arith.constant 0 : i32
    %c0_i32_0 = arith.constant 0 : i32
    %c0_i32_1 = arith.constant 0 : i32
    return %c0_i32, %c0_i32_0 : i32, i32
  }
  func.func @transform_4(%arg0: i32) -> (i32, i32) {
    %c0_i32 = arith.constant 0 : i32
    %c0_i32_0 = arith.constant 0 : i32
    %c0_i32_1 = arith.constant 0 : i32
    return %c0_i32, %c0_i32_0 : i32, i32
  }
  func.func @transform_5(%arg0: i32) -> (i32, i32) {
    %c0_i32 = arith.constant 0 : i32
    %c0_i32_0 = arith.constant 0 : i32
    %c0_i32_1 = arith.constant 0 : i32
    return %c0_i32, %c0_i32_0 : i32, i32
  }
  func.func @transform_6(%arg0: i32) -> (i32, i32) {
    %c0_i32 = arith.constant 0 : i32
    %c0_i32_0 = arith.constant 0 : i32
    %c0_i32_1 = arith.constant 0 : i32
    return %c0_i32, %c0_i32_0 : i32, i32
  }
  func.func @transform_7(%arg0: i32) -> (i32, i32) {
    %c0_i32 = arith.constant 0 : i32
    %c0_i32_0 = arith.constant 0 : i32
    return %arg0, %c0_i32 : i32, i32
  }
}

module attributes {stable_mosaic.version = 11 : i64} {
  func.func @_fused_mlp_kernel(%arg0: i32, %arg1: memref<8x128xf32, #tpu.memory_space<vmem>>, %arg2: memref<128x128xbf16, #tpu.memory_space<vmem>>, %arg3: memref<1x128xf32, #tpu.memory_space<vmem>>, %arg4: memref<128x128xbf16, #tpu.memory_space<vmem>>, %arg5: memref<1x128xf32, #tpu.memory_space<vmem>>, %arg6: memref<128x128xbf16, #tpu.memory_space<vmem>>, %arg7: memref<1x128xf32, #tpu.memory_space<vmem>>, %arg8: memref<8x128xf32, #tpu.memory_space<vmem>>) attributes {dimension_semantics = [#tpu.dimension_semantics<parallel>], iteration_bounds = array<i64: 1>, scalar_prefetch = 0 : i64, scratch_operands = 0 : i64, tpu.core_type = #tpu.core_type<tc>, window_params = [{transform_indices = @transform_0, window_bounds = array<i64: 8, 128>}, {pipeline_mode = #tpu.pipeline_mode<synchronous>, transform_indices = @transform_1, window_bounds = array<i64: 128, 128>}, {pipeline_mode = #tpu.pipeline_mode<synchronous>, transform_indices = @transform_2, window_bounds = array<i64: 1, 128>}, {pipeline_mode = #tpu.pipeline_mode<synchronous>, transform_indices = @transform_3, window_bounds = array<i64: 128, 128>}, {pipeline_mode = #tpu.pipeline_mode<synchronous>, transform_indices = @transform_4, window_bounds = array<i64: 1, 128>}, {pipeline_mode = #tpu.pipeline_mode<synchronous>, transform_indices = @transform_5, window_bounds = array<i64: 128, 128>}, {pipeline_mode = #tpu.pipeline_mode<synchronous>, transform_indices = @transform_6, window_bounds = array<i64: 1, 128>}, {transform_indices = @transform_7, window_bounds = array<i64: 8, 128>}]} {
    %c0 = arith.constant 0 : index
    %c0_0 = arith.constant 0 : index
    %0 = vector.load %arg1[%c0, %c0_0] : memref<8x128xf32, #tpu.memory_space<vmem>>, vector<8x128xf32>
    %1 = arith.truncf %0 : vector<8x128xf32> to vector<8x128xbf16>
    %c0_1 = arith.constant 0 : index
    %c0_2 = arith.constant 0 : index
    %2 = vector.load %arg2[%c0_1, %c0_2] : memref<128x128xbf16, #tpu.memory_space<vmem>>, vector<128x128xbf16>
    %c0_3 = arith.constant 0 : index
    %c0_4 = arith.constant 0 : index
    %3 = vector.load %arg3[%c0_3, %c0_4] : memref<1x128xf32, #tpu.memory_space<vmem>>, vector<1x128xf32>
    %cst = arith.constant dense<0.000000e+00> : vector<8x128xf32>
    %4 = tpu.matmul %1, %2, %cst {dimension_numbers = #tpu.dot_dimension_numbers<[1], [0], [0], [1], [0, 0, 1, 1], [], []>} : vector<8x128xbf16>, vector<128x128xbf16>, vector<8x128xf32> -> vector<8x128xf32>
    %5 = arith.truncf %4 : vector<8x128xf32> to vector<8x128xbf16>
    %6 = arith.truncf %3 : vector<1x128xf32> to vector<1x128xbf16>
    %7 = vector.broadcast %6 : vector<1x128xbf16> to vector<8x128xbf16>
    %8 = arith.addf %5, %7 : vector<8x128xbf16>
    %cst_5 = arith.constant 0.000000e+00 : bf16
    %9 = vector.broadcast %cst_5 : bf16 to vector<8x128xbf16>
    %10 = arith.maximumf %8, %9 : vector<8x128xbf16>
    %c0_6 = arith.constant 0 : index
    %c0_7 = arith.constant 0 : index
    %11 = vector.load %arg4[%c0_6, %c0_7] : memref<128x128xbf16, #tpu.memory_space<vmem>>, vector<128x128xbf16>
    %c0_8 = arith.constant 0 : index
    %c0_9 = arith.constant 0 : index
    %12 = vector.load %arg5[%c0_8, %c0_9] : memref<1x128xf32, #tpu.memory_space<vmem>>, vector<1x128xf32>
    %cst_10 = arith.constant dense<0.000000e+00> : vector<8x128xf32>
    %13 = tpu.matmul %10, %11, %cst_10 {dimension_numbers = #tpu.dot_dimension_numbers<[1], [0], [0], [1], [0, 0, 1, 1], [], []>} : vector<8x128xbf16>, vector<128x128xbf16>, vector<8x128xf32> -> vector<8x128xf32>
    %14 = arith.truncf %13 : vector<8x128xf32> to vector<8x128xbf16>
    %15 = arith.truncf %12 : vector<1x128xf32> to vector<1x128xbf16>
    %16 = vector.broadcast %15 : vector<1x128xbf16> to vector<8x128xbf16>
    %17 = arith.addf %14, %16 : vector<8x128xbf16>
    %cst_11 = arith.constant 0.000000e+00 : bf16
    %18 = vector.broadcast %cst_11 : bf16 to vector<8x128xbf16>
    %19 = arith.maximumf %17, %18 : vector<8x128xbf16>
    %c0_12 = arith.constant 0 : index
    %c0_13 = arith.constant 0 : index
    %20 = vector.load %arg6[%c0_12, %c0_13] : memref<128x128xbf16, #tpu.memory_space<vmem>>, vector<128x128xbf16>
    %c0_14 = arith.constant 0 : index
    %c0_15 = arith.constant 0 : index
    %21 = vector.load %arg7[%c0_14, %c0_15] : memref<1x128xf32, #tpu.memory_space<vmem>>, vector<1x128xf32>
    %cst_16 = arith.constant dense<0.000000e+00> : vector<8x128xf32>
    %22 = tpu.matmul %19, %20, %cst_16 {dimension_numbers = #tpu.dot_dimension_numbers<[1], [0], [0], [1], [0, 0, 1, 1], [], []>} : vector<8x128xbf16>, vector<128x128xbf16>, vector<8x128xf32> -> vector<8x128xf32>
    %23 = arith.truncf %22 : vector<8x128xf32> to vector<8x128xbf16>
    %24 = arith.truncf %21 : vector<1x128xf32> to vector<1x128xbf16>
    %25 = vector.broadcast %24 : vector<1x128xbf16> to vector<8x128xbf16>
    %26 = arith.addf %23, %25 : vector<8x128xbf16>
    %27 = arith.extf %26 : vector<8x128xbf16> to vector<8x128xf32>
    %c0_17 = arith.constant 0 : index
    %c0_18 = arith.constant 0 : index
    %28 = vector.load %arg8[%c0_17, %c0_18] : memref<8x128xf32, #tpu.memory_space<vmem>>, vector<8x128xf32>
    tpu.vector_store %arg8[%c0_17, %c0_18], %27 {strides = array<i32>} : memref<8x128xf32, #tpu.memory_space<vmem>>, vector<8x128xf32>,
    return
  }
  func.func @transform_0(%arg0: i32) -> (i32, i32) {
    %c0_i32 = arith.constant 0 : i32
    %c0_i32_0 = arith.constant 0 : i32
    return %arg0, %c0_i32 : i32, i32
  }
  func.func @transform_1(%arg0: i32) -> (i32, i32) {
    %c0_i32 = arith.constant 0 : i32
    %c0_i32_0 = arith.constant 0 : i32
    %c0_i32_1 = arith.constant 0 : i32
    return %c0_i32, %c0_i32_0 : i32, i32
  }
  func.func @transform_2(%arg0: i32) -> (i32, i32) {
    %c0_i32 = arith.constant 0 : i32
    %c0_i32_0 = arith.constant 0 : i32
    %c0_i32_1 = arith.constant 0 : i32
    return %c0_i32, %c0_i32_0 : i32, i32
  }
  func.func @transform_3(%arg0: i32) -> (i32, i32) {
    %c0_i32 = arith.constant 0 : i32
    %c0_i32_0 = arith.constant 0 : i32
    %c0_i32_1 = arith.constant 0 : i32
    return %c0_i32, %c0_i32_0 : i32, i32
  }
  func.func @transform_4(%arg0: i32) -> (i32, i32) {
    %c0_i32 = arith.constant 0 : i32
    %c0_i32_0 = arith.constant 0 : i32
    %c0_i32_1 = arith.constant 0 : i32
    return %c0_i32, %c0_i32_0 : i32, i32
  }
  func.func @transform_5(%arg0: i32) -> (i32, i32) {
    %c0_i32 = arith.constant 0 : i32
    %c0_i32_0 = arith.constant 0 : i32
    %c0_i32_1 = arith.constant 0 : i32
    return %c0_i32, %c0_i32_0 : i32, i32
  }
  func.func @transform_6(%arg0: i32) -> (i32, i32) {
    %c0_i32 = arith.constant 0 : i32
    %c0_i32_0 = arith.constant 0 : i32
    %c0_i32_1 = arith.constant 0 : i32
    return %c0_i32, %c0_i32_0 : i32, i32
  }
  func.func @transform_7(%arg0: i32) -> (i32, i32) {
    %c0_i32 = arith.constant 0 : i32
    %c0_i32_0 = arith.constant 0 : i32
    return %arg0, %c0_i32 : i32, i32
  }
}

</mosaic_0001>

<bundles_post_ra>
// kernel: tpu_custom_call.1
= control target key start
LH: loop header
LB: loop body
LE: loop exit
PB: predicated region body
PF: predicated region fallthrough
CT: control target
= control target key end

     0   :  { %12 = vsyncpa [#allocation3], 0  ;;  %s815_s0 = inlined_call_operand.hbm [shape: f32[8,128], index: 0, kind: input, shape index: {}]   ;;  %s816_s1 = inlined_call_operand.hbm [shape: bf16[128,128], index: 1, kind: input, shape index: {}]   ;;  %s817_s2 = inlined_call_operand.vmem [shape: f32[1,128], index: 2, kind: input, shape index: {}]   ;;  %s818_s3 = inlined_call_operand.hbm [shape: bf16[128,128], index: 3, kind: input, shape index: {}]   ;;  %s819_s4 = inlined_call_operand.vmem [shape: f32[1,128], index: 4, kind: input, shape index: {}]   ;;  %s820_s5 = inlined_call_operand.hbm [shape: bf16[128,128], index: 5, kind: input, shape index: {}]   ;;  %s821_s6 = inlined_call_operand.vmem [shape: f32[1,128], index: 6, kind: input, shape index: {}]   ;;  %s822_s7 = inlined_call_operand.hbm [shape: f32[8,128], index: 7, kind: output, shape index: {}]  }
   0x1   :  { %13 = vsyncpa [#allocation6], 0 }
   0x2   :  { %14 = vsyncpa [#allocation9], 0 }
   0x3   :  { %15 = vsyncpa [#allocation4], 0  ;;  %s702_s24 = smov [#allocation5]  }
   0x4   :  { %s31_s25 = sshll.u32 %s702_s24, 4  ;;  %s32_s25 = int_to_ptr.vmem [resolvable:$true] %s31_s25 }
   0x5   :  { %s602_s26 = scalar_lea.vmem %s32_s25, 1024  ;;  %p607_p1 = scmp.lt.s32.totalorder %s32_s25, %s32_s25 }
   0x6   :  { %p603_p0 = scmp.ne.s32.totalorder %s32_s25, %s602_s26  ;;  %p608_p2 = scmp.lt.s32.totalorder %s602_s26, %s602_s26 }
   0x8   :  { %p609_p3 = por %p608_p2, %p607_p1 }
   0xa   :  { %p610_p4 = pnand %p609_p3, %p603_p0 }
   0xc   :  { %613 = shalt.err (!%p610_p4)
}
   0xd   :  { %s703_s27 = smov 64   ;;  %s704_s28 = smov 4  }
   0xe   :  { %37 = dma.hbm_to_vmem [thread:$0]  %s816_s1, 1024, %s32_s25, [#allocation6], %s703_s27, %s703_s27, %s704_s28  }
   0xf   :  { %s705_s8 = smov [#allocation2]   ;;  %s706_s10 = smov [#allocation7]  }
  0x10   :  { %s22_s9 = sshll.u32 %s705_s8, 4  ;;  %s45_s11 = sshll.u32 %s706_s10, 4  ;;  %s23_s9 = int_to_ptr.vmem [resolvable:$true] %s22_s9  ;;  %s46_s11 = int_to_ptr.vmem [resolvable:$true] %s45_s11 }
  0x11   :  { %s622_s12 = scalar_lea.vmem %s23_s9, 128  ;;  %p627_p6 = scmp.lt.s32.totalorder %s23_s9, %s23_s9 }
  0x12   :  { %p623_p5 = scmp.ne.s32.totalorder %s23_s9, %s622_s12  ;;  %p628_p7 = scmp.lt.s32.totalorder %s622_s12, %s622_s12 }
  0x14   :  { %p629_p8 = por %p628_p7, %p627_p6 }
  0x16   :  { %p630_p9 = pnand %p629_p8, %p623_p5 }
  0x18   :  { %633 = shalt.err (!%p630_p9)
}
  0x19   :  { %25 = dma.hbm_to_vmem [thread:$0]  %s815_s0, 128, %s23_s9, [#allocation3]  }
  0x1a   :  { %s642_s15 = scalar_lea.vmem %s46_s11, 1024  ;;  %p647_p11 = scmp.lt.s32.totalorder %s46_s11, %s46_s11 }
  0x1b   :  { %p643_p10 = scmp.ne.s32.totalorder %s46_s11, %s642_s15  ;;  %p648_p12 = scmp.lt.s32.totalorder %s642_s15, %s642_s15 }
  0x1d   :  { %p649_p13 = por %p648_p12, %p647_p11 }
  0x1f   :  { %p650_p0 = pnand %p649_p13, %p643_p10 }
  0x21   :  { %653 = shalt.err (!%p650_p0)
}
  0x22   :  { %51 = dma.hbm_to_vmem [thread:$0]  %s818_s3, 1024, %s46_s11, [#allocation6], %s703_s27, %s703_s27, %s704_s28  }
  0x23   :  { %s707_s17 = smov [#allocation8]  }
  0x24   :  { %s59_s18 = sshll.u32 %s707_s17, 4  ;;  %s60_s18 = int_to_ptr.vmem [resolvable:$true] %s59_s18 }
  0x25   :  { %s662_s19 = scalar_lea.vmem %s60_s18, 1024  ;;  %p667_p2 = scmp.lt.s32.totalorder %s60_s18, %s60_s18 }
  0x26   :  { %p663_p1 = scmp.ne.s32.totalorder %s60_s18, %s662_s19  ;;  %p668_p3 = scmp.lt.s32.totalorder %s662_s19, %s662_s19 }
  0x28   :  { %p669_p4 = por %p668_p3, %p667_p2 }
  0x2a   :  { %p670_p5 = pnand %p669_p4, %p663_p1 }
  0x2c   :  { %673 = shalt.err (!%p670_p5)
}
  0x2d   :  { %65 = dma.hbm_to_vmem [thread:$0]  %s820_s5, 1024, %s60_s18, [#allocation9], %s703_s27, %s703_s27, %s704_s28  }
  0x2e   :  { %694 = dma.done.wait [#allocation3], 128  }
  0x2f   :  { %695 = vsyncadd [#allocation3], 4294967168 }
  0x30   :  { %696 = dma.done.wait [#allocation6], 2048  }
  0x31   :  { %697 = vsyncadd [#allocation6], 4294965248 }
  0x32   :  { %698 = dma.done.wait [#allocation9], 1024  }
  0x33   :  { %699 = vsyncadd [#allocation9], 4294966272  ;;  %v708_v0 = vmov 0.0   ;;  %vm709_vm0 = vmmov 0   ;;  %v570_v1 = vld [vmem:[#allocation5 + $0x38] sm:$0xff]   ;;  %v571_v2 = vld [vmem:[#allocation5 + $0x30] sm:$0xff]   ;;  %v193_v25 = vlaneseq }
  0x34   :  { %500 = vmatprep.subr.bf16.mxu0 %v708_v0  ;;  %516 = vmatprep.mubr.msk.bf16.mxu0 %vm709_vm0, %v708_v0  ;;  %v572_v3 = vld [vmem:[#allocation5 + $0x28] sm:$0xff]   ;;  %v578_v4 = vld [vmem:[#allocation7 + $0x38] sm:$0xff]   ;;  %v573_v5 = vld [vmem:[#allocation5 + $0x20] sm:$0xff]   ;;  %v710_v37 = vmov 0  }
  0x35   :  { %520 = vmatprep.subr.bf16.mxu1 %v708_v0  ;;  %536 = vmatprep.mubr.msk.bf16.mxu1 %vm709_vm0, %v708_v0  ;;  %v579_v6 = vld [vmem:[#allocation7 + $0x30] sm:$0xff]   ;;  %v574_v7 = vld [vmem:[#allocation5 + $0x18] sm:$0xff]   ;;  %v580_v8 = vld [vmem:[#allocation7 + $0x28] sm:$0xff]   ;;  %v194_v28 = vshrl.u32 %v193_v25, 7 }
  0x36   :  { %501 = vmatpush3.bf16.msra.mxu0 %v570_v1  ;;  %521 = vmatpush3.bf16.msra.mxu1 %v578_v4  ;;  %v575_v9 = vld [vmem:[#allocation5 + $0x10] sm:$0xff]   ;;  %v581_v10 = vld [vmem:[#allocation7 + $0x20] sm:$0xff]   ;;  %v576_v11 = vld [vmem:[#allocation5 + $0x8] sm:$0xff]  }
  0x37   :  { %502 = vmatprep.subr.bf16.mxu0 %v708_v0  ;;  %522 = vmatprep.subr.bf16.mxu1 %v708_v0  ;;  %v582_v12 = vld [vmem:[#allocation7 + $0x18] sm:$0xff]   ;;  %v577_v13 = vld [vmem:[#allocation5] sm:$0xff]   ;;  %v583_v15 = vld [vmem:[#allocation7 + $0x10] sm:$0xff]   ;;  %v195_v30 = vsub.s32 0, %v194_v28 }
  0x38   :  { %v81_v14 = vld [vmem:[#allocation2] sm:$0xff]  ;;  %v584_v17 = vld [vmem:[#allocation7 + $0x8] sm:$0xff]   ;;  %v585_v18 = vld [vmem:[#allocation7] sm:$0xff]  }
  0x39   :  { %v82_v16 = vpack.c.bf16 %v81_v14, %v81_v14  ;;  %v586_v19 = vld [vmem:[#allocation8 + $0x38] sm:$0xff]   ;;  %v587_v20 = vld [vmem:[#allocation8 + $0x30] sm:$0xff]   ;;  %v588_v21 = vld [vmem:[#allocation8 + $0x28] sm:$0xff]  }
  0x3a   :  { %503 = vmatpush3.bf16.msra.mxu0 %v571_v2  ;;  %523 = vmatpush3.bf16.msra.mxu1 %v579_v6  ;;  %v589_v22 = vld [vmem:[#allocation8 + $0x20] sm:$0xff]   ;;  %v590_v23 = vld [vmem:[#allocation8 + $0x18] sm:$0xff]   ;;  %v591_v24 = vld [vmem:[#allocation8 + $0x10] sm:$0xff]  }
  0x3b   :  { %504 = vmatprep.subr.bf16.mxu0 %v708_v0  ;;  %524 = vmatprep.subr.bf16.mxu1 %v708_v0  ;;  %v99_v26 = vld [vmem:[%s817_s2] sm:$0x1]  ;;  %v592_v40 = vld [vmem:[#allocation8 + $0x8] sm:$0xff]   ;;  %v593_v41 = vld [vmem:[#allocation8] sm:$0xff]  }
  0x3c   :  { %v189_v27 = vpack.c.bf16 %v99_v26, %v99_v26  ;;  %v215_v42 = vld [vmem:[%s819_s4] sm:$0x1]  ;;  %s711_s4 = smov [#allocation10]  }
  0x3d   :  { %v305_v43 = vpack.c.bf16 %v215_v42, %v215_v42  ;;  %v331_v53 = vld [vmem:[%s821_s6] sm:$0x1]  ;;  %s438_s24 = sshll.u32 %s711_s4, 4  ;;  %s439_s24 = int_to_ptr.vmem [resolvable:$true] %s438_s24 }
  0x3e   :  { %505 = vmatpush3.bf16.msra.mxu0 %v572_v3  ;;  %525 = vmatpush3.bf16.msra.mxu1 %v580_v8  ;;  %v191_v29 = vpack.i.b16 %v189_v27, %v189_v27  ;;  %v421_v54 = vpack.c.bf16 %v331_v53, %v331_v53  ;;  %s674_s25 = scalar_lea.vmem %s439_s24, 128  ;;  %p679_p7 = scmp.lt.s32.totalorder %s439_s24, %s439_s24 }
  0x3f   :  { %506 = vmatprep.subr.bf16.mxu0 %v708_v0  ;;  %526 = vmatprep.subr.bf16.mxu1 %v708_v0  ;;  %v307_v44 = vpack.i.b16 %v305_v43, %v305_v43  ;;  %p675_p6 = scmp.ne.s32.totalorder %s439_s24, %s674_s25  ;;  %p680_p8 = scmp.lt.s32.totalorder %s674_s25, %s674_s25 }
  0x40   :  { %v196_v31 = vrot.slane %v191_v29, %v195_v30  ;;  %v423_v55 = vpack.i.b16 %v421_v54, %v421_v54 }
  0x41   :  { %v312_v45 = vrot.slane %v307_v44, %v195_v30  ;;  %p681_p9 = por %p680_p8, %p679_p7 }
  0x42   :  { %507 = vmatpush3.bf16.msra.mxu0 %v573_v5  ;;  %527 = vmatpush3.bf16.msra.mxu1 %v581_v10  ;;  %v428_v56 = vrot.slane %v423_v55, %v195_v30 }
  0x43   :  { %508 = vmatprep.subr.bf16.mxu0 %v708_v0  ;;  %528 = vmatprep.subr.bf16.mxu1 %v708_v0  ;;  %p682_p10 = pnand %p681_p9, %p675_p6 }
  0x46   :  { %509 = vmatpush3.bf16.msra.mxu0 %v574_v7  ;;  %529 = vmatpush3.bf16.msra.mxu1 %v582_v12 }
  0x47   :  { %510 = vmatprep.subr.bf16.mxu0 %v708_v0  ;;  %530 = vmatprep.subr.bf16.mxu1 %v708_v0 }
  0x4a   :  { %511 = vmatpush3.bf16.msra.mxu0 %v575_v9  ;;  %531 = vmatpush3.bf16.msra.mxu1 %v583_v15 }
  0x4b   :  { %512 = vmatprep.subr.bf16.mxu0 %v708_v0  ;;  %532 = vmatprep.subr.bf16.mxu1 %v708_v0 }
  0x4e   :  { %513 = vmatpush3.bf16.msra.mxu0 %v576_v11  ;;  %533 = vmatpush3.bf16.msra.mxu1 %v584_v17 }
  0x4f   :  { %514 = vmatprep.subr.bf16.mxu0 %v708_v0  ;;  %534 = vmatprep.subr.bf16.mxu1 %v708_v0 }
  0x52   :  { %515 = vmatpush3.bf16.msra.mxu0 %v577_v13  ;;  %535 = vmatpush3.bf16.msra.mxu1 %v585_v18 }
  0x53   :  { %540 = vmatprep.subr.bf16.mxu0 %v708_v0 }
  0x55   :  { %517 = vmatmul.mubr.bf16.vlgmr.msra.gmra.mxu0 %v82_v16 }
  0x56   :  { %556 = vmatprep.mubr.msk.bf16.mxu0 %vm709_vm0, %v708_v0  ;;  %541 = vmatpush3.bf16.msra.mxu0 %v586_v19 }
  0x57   :  { %542 = vmatprep.subr.bf16.mxu0 %v708_v0 }
  0x5a   :  { %543 = vmatpush3.bf16.msra.mxu0 %v587_v20 }
  0x5b   :  { %544 = vmatprep.subr.bf16.mxu0 %v708_v0 }
  0x5e   :  { %545 = vmatpush3.bf16.msra.mxu0 %v588_v21 }
  0x5f   :  { %546 = vmatprep.subr.bf16.mxu0 %v708_v0 }
  0x62   :  { %547 = vmatpush3.bf16.msra.mxu0 %v589_v22 }
  0x63   :  { %548 = vmatprep.subr.bf16.mxu0 %v708_v0 }
  0x66   :  { %549 = vmatpush3.bf16.msra.mxu0 %v590_v23 }
  0x67   :  { %550 = vmatprep.subr.bf16.mxu0 %v708_v0 }
  0x6a   :  { %551 = vmatpush3.bf16.msra.mxu0 %v591_v24 }
  0x6b   :  { %552 = vmatprep.subr.bf16.mxu0 %v708_v0 }
  0x6e   :  { %553 = vmatpush3.bf16.msra.mxu0 %v592_v40 }
  0x6f   :  { %554 = vmatprep.subr.bf16.mxu0 %v708_v0 }
  0x72   :  { %555 = vmatpush3.bf16.msra.mxu0 %v593_v41 }
 0x115   :  { %v182_v32 = vpop.f32.mrf.mxu0 }
 0x116   :  { %v188_v33 = vpack.c.bf16 %v182_v32, %v182_v32 }
 0x117   :  { %v518_v34 = vpop.f32.mrf.mxu0 }
 0x118   :  { %v197_v35 = vadd.bf16 %v196_v31, %v188_v33 }
 0x119   :  { %v185_v36 = vpop.f32.mrf.mxu0 }
 0x11a   :  { %v198_v38 = vmax.bf16 %v710_v37, %v197_v35 }
 0x11b   :  { %v519_v39 = vpop.f32.mrf.mxu0 }
 0x11c   :  { %537 = vmatmul.mubr.bf16.vlgmr.msra.gmra.mxu1 %v198_v38 }
 0x1dc   :  { %v298_v46 = vpop.f32.mrf.mxu1 }
 0x1dd   :  { %v304_v47 = vpack.c.bf16 %v298_v46, %v298_v46 }
 0x1de   :  { %v538_v48 = vpop.f32.mrf.mxu1 }
 0x1df   :  { %v313_v49 = vadd.bf16 %v312_v45, %v304_v47 }
 0x1e0   :  { %v301_v50 = vpop.f32.mrf.mxu1 }
 0x1e1   :  { %v314_v51 = vmax.bf16 %v710_v37, %v313_v49 }
 0x1e2   :  { %v539_v52 = vpop.f32.mrf.mxu1 }
 0x1e3   :  { %557 = vmatmul.mubr.bf16.vlgmr.msra.gmra.mxu0 %v314_v51 }
 0x2a3   :  { %v414_v57 = vpop.f32.mrf.mxu0 }
 0x2a4   :  { %v420_v58 = vpack.c.bf16 %v414_v57, %v414_v57 }
 0x2a5   :  { %v558_v59 = vpop.f32.mrf.mxu0 }
 0x2a6   :  { %v429_v60 = vadd.bf16 %v428_v56, %v420_v58 }
 0x2a7   :  { %v417_v61 = vpop.f32.mrf.mxu0 }
 0x2a8   :  { %v430_v62 = vunpack.c.l.bf16 %v429_v60 }
 0x2a9   :  { %v559_v63 = vpop.f32.mrf.mxu0 }
 0x2aa   :  { %431 = vst [vmem:[#allocation10] sm:$0xff] %v430_v62 }
 0x2ab   :  { %685 = shalt.err (!%p682_p10)
}
 0x2ac   :  { %441 = dma.vmem_to_hbm [thread:$0]  %s439_s24, 128, %s822_s7, [#allocation4]  }
 0x2ad   :  { %700 = dma.done.wait [#allocation4], 128  }
 0x2ae   :  { %701 = vsyncadd [#allocation4], 4294967168 }
 0x2af   :  { %445 = vsyncpa [#allocation3], 1 }
 0x2b0   :  { %446 = vsyncpa [#allocation6], 1 }
 0x2b1   :  { %447 = vsyncpa [#allocation9], 1 }
 0x2b2   :  { %448 = vsyncpa [#allocation4], 1 }

// kernel: tpu_custom_call.1
= control target key start
LH: loop header
LB: loop body
LE: loop exit
PB: predicated region body
PF: predicated region fallthrough
CT: control target
= control target key end

     0   :  { %12 = vsyncpa [#allocation3], 0  ;;  %s815_s0 = inlined_call_operand.hbm [shape: f32[8,128], index: 0, kind: input, shape index: {}]   ;;  %s816_s1 = inlined_call_operand.hbm [shape: bf16[128,128], index: 1, kind: input, shape index: {}]   ;;  %s817_s2 = inlined_call_operand.vmem [shape: f32[1,128], index: 2, kind: input, shape index: {}]   ;;  %s818_s3 = inlined_call_operand.hbm [shape: bf16[128,128], index: 3, kind: input, shape index: {}]   ;;  %s819_s4 = inlined_call_operand.vmem [shape: f32[1,128], index: 4, kind: input, shape index: {}]   ;;  %s820_s5 = inlined_call_operand.hbm [shape: bf16[128,128], index: 5, kind: input, shape index: {}]   ;;  %s821_s6 = inlined_call_operand.vmem [shape: f32[1,128], index: 6, kind: input, shape index: {}]   ;;  %s822_s7 = inlined_call_operand.hbm [shape: f32[8,128], index: 7, kind: output, shape index: {}]  }
   0x1   :  { %13 = vsyncpa [#allocation6], 0 }
   0x2   :  { %14 = vsyncpa [#allocation9], 0 }
   0x3   :  { %15 = vsyncpa [#allocation4], 0  ;;  %s702_s24 = smov [#allocation5]  }
   0x4   :  { %s31_s25 = sshll.u32 %s702_s24, 4  ;;  %s32_s25 = int_to_ptr.vmem [resolvable:$true] %s31_s25 }
   0x5   :  { %s602_s26 = scalar_lea.vmem %s32_s25, 1024  ;;  %p607_p1 = scmp.lt.s32.totalorder %s32_s25, %s32_s25 }
   0x6   :  { %p603_p0 = scmp.ne.s32.totalorder %s32_s25, %s602_s26  ;;  %p608_p2 = scmp.lt.s32.totalorder %s602_s26, %s602_s26 }
   0x8   :  { %p609_p3 = por %p608_p2, %p607_p1 }
   0xa   :  { %p610_p4 = pnand %p609_p3, %p603_p0 }
   0xc   :  { %613 = shalt.err (!%p610_p4)
}
   0xd   :  { %s703_s27 = smov 64   ;;  %s704_s28 = smov 4  }
   0xe   :  { %37 = dma.hbm_to_vmem [thread:$0]  %s816_s1, 1024, %s32_s25, [#allocation6], %s703_s27, %s703_s27, %s704_s28  }
   0xf   :  { %s705_s8 = smov [#allocation2]   ;;  %s706_s10 = smov [#allocation7]  }
  0x10   :  { %s22_s9 = sshll.u32 %s705_s8, 4  ;;  %s45_s11 = sshll.u32 %s706_s10, 4  ;;  %s23_s9 = int_to_ptr.vmem [resolvable:$true] %s22_s9  ;;  %s46_s11 = int_to_ptr.vmem [resolvable:$true] %s45_s11 }
  0x11   :  { %s622_s12 = scalar_lea.vmem %s23_s9, 128  ;;  %p627_p6 = scmp.lt.s32.totalorder %s23_s9, %s23_s9 }
  0x12   :  { %p623_p5 = scmp.ne.s32.totalorder %s23_s9, %s622_s12  ;;  %p628_p7 = scmp.lt.s32.totalorder %s622_s12, %s622_s12 }
  0x14   :  { %p629_p8 = por %p628_p7, %p627_p6 }
  0x16   :  { %p630_p9 = pnand %p629_p8, %p623_p5 }
  0x18   :  { %633 = shalt.err (!%p630_p9)
}
  0x19   :  { %25 = dma.hbm_to_vmem [thread:$0]  %s815_s0, 128, %s23_s9, [#allocation3]  }
  0x1a   :  { %s642_s15 = scalar_lea.vmem %s46_s11, 1024  ;;  %p647_p11 = scmp.lt.s32.totalorder %s46_s11, %s46_s11 }
  0x1b   :  { %p643_p10 = scmp.ne.s32.totalorder %s46_s11, %s642_s15  ;;  %p648_p12 = scmp.lt.s32.totalorder %s642_s15, %s642_s15 }
  0x1d   :  { %p649_p13 = por %p648_p12, %p647_p11 }
  0x1f   :  { %p650_p0 = pnand %p649_p13, %p643_p10 }
  0x21   :  { %653 = shalt.err (!%p650_p0)
}
  0x22   :  { %51 = dma.hbm_to_vmem [thread:$0]  %s818_s3, 1024, %s46_s11, [#allocation6], %s703_s27, %s703_s27, %s704_s28  }
  0x23   :  { %s707_s17 = smov [#allocation8]  }
  0x24   :  { %s59_s18 = sshll.u32 %s707_s17, 4  ;;  %s60_s18 = int_to_ptr.vmem [resolvable:$true] %s59_s18 }
  0x25   :  { %s662_s19 = scalar_lea.vmem %s60_s18, 1024  ;;  %p667_p2 = scmp.lt.s32.totalorder %s60_s18, %s60_s18 }
  0x26   :  { %p663_p1 = scmp.ne.s32.totalorder %s60_s18, %s662_s19  ;;  %p668_p3 = scmp.lt.s32.totalorder %s662_s19, %s662_s19 }
  0x28   :  { %p669_p4 = por %p668_p3, %p667_p2 }
  0x2a   :  { %p670_p5 = pnand %p669_p4, %p663_p1 }
  0x2c   :  { %673 = shalt.err (!%p670_p5)
}
  0x2d   :  { %65 = dma.hbm_to_vmem [thread:$0]  %s820_s5, 1024, %s60_s18, [#allocation9], %s703_s27, %s703_s27, %s704_s28  }
  0x2e   :  { %694 = dma.done.wait [#allocation3], 128  }
  0x2f   :  { %695 = vsyncadd [#allocation3], 4294967168 }
  0x30   :  { %696 = dma.done.wait [#allocation6], 2048  }
  0x31   :  { %697 = vsyncadd [#allocation6], 4294965248 }
  0x32   :  { %698 = dma.done.wait [#allocation9], 1024  }
  0x33   :  { %699 = vsyncadd [#allocation9], 4294966272  ;;  %v708_v0 = vmov 0.0   ;;  %vm709_vm0 = vmmov 0   ;;  %v570_v1 = vld [vmem:[#allocation5 + $0x38] sm:$0xff]   ;;  %v571_v2 = vld [vmem:[#allocation5 + $0x30] sm:$0xff]   ;;  %v193_v25 = vlaneseq }
  0x34   :  { %500 = vmatprep.subr.bf16.mxu0 %v708_v0  ;;  %516 = vmatprep.mubr.msk.bf16.mxu0 %vm709_vm0, %v708_v0  ;;  %v572_v3 = vld [vmem:[#allocation5 + $0x28] sm:$0xff]   ;;  %v578_v4 = vld [vmem:[#allocation7 + $0x38] sm:$0xff]   ;;  %v573_v5 = vld [vmem:[#allocation5 + $0x20] sm:$0xff]   ;;  %v710_v37 = vmov 0  }
  0x35   :  { %520 = vmatprep.subr.bf16.mxu1 %v708_v0  ;;  %536 = vmatprep.mubr.msk.bf16.mxu1 %vm709_vm0, %v708_v0  ;;  %v579_v6 = vld [vmem:[#allocation7 + $0x30] sm:$0xff]   ;;  %v574_v7 = vld [vmem:[#allocation5 + $0x18] sm:$0xff]   ;;  %v580_v8 = vld [vmem:[#allocation7 + $0x28] sm:$0xff]   ;;  %v194_v28 = vshrl.u32 %v193_v25, 7 }
  0x36   :  { %501 = vmatpush3.bf16.msra.mxu0 %v570_v1  ;;  %521 = vmatpush3.bf16.msra.mxu1 %v578_v4  ;;  %v575_v9 = vld [vmem:[#allocation5 + $0x10] sm:$0xff]   ;;  %v581_v10 = vld [vmem:[#allocation7 + $0x20] sm:$0xff]   ;;  %v576_v11 = vld [vmem:[#allocation5 + $0x8] sm:$0xff]  }
  0x37   :  { %502 = vmatprep.subr.bf16.mxu0 %v708_v0  ;;  %522 = vmatprep.subr.bf16.mxu1 %v708_v0  ;;  %v582_v12 = vld [vmem:[#allocation7 + $0x18] sm:$0xff]   ;;  %v577_v13 = vld [vmem:[#allocation5] sm:$0xff]   ;;  %v583_v15 = vld [vmem:[#allocation7 + $0x10] sm:$0xff]   ;;  %v195_v30 = vsub.s32 0, %v194_v28 }
  0x38   :  { %v81_v14 = vld [vmem:[#allocation2] sm:$0xff]  ;;  %v584_v17 = vld [vmem:[#allocation7 + $0x8] sm:$0xff]   ;;  %v585_v18 = vld [vmem:[#allocation7] sm:$0xff]  }
  0x39   :  { %v82_v16 = vpack.c.bf16 %v81_v14, %v81_v14  ;;  %v586_v19 = vld [vmem:[#allocation8 + $0x38] sm:$0xff]   ;;  %v587_v20 = vld [vmem:[#allocation8 + $0x30] sm:$0xff]   ;;  %v588_v21 = vld [vmem:[#allocation8 + $0x28] sm:$0xff]  }
  0x3a   :  { %503 = vmatpush3.bf16.msra.mxu0 %v571_v2  ;;  %523 = vmatpush3.bf16.msra.mxu1 %v579_v6  ;;  %v589_v22 = vld [vmem:[#allocation8 + $0x20] sm:$0xff]   ;;  %v590_v23 = vld [vmem:[#allocation8 + $0x18] sm:$0xff]   ;;  %v591_v24 = vld [vmem:[#allocation8 + $0x10] sm:$0xff]  }
  0x3b   :  { %504 = vmatprep.subr.bf16.mxu0 %v708_v0  ;;  %524 = vmatprep.subr.bf16.mxu1 %v708_v0  ;;  %v99_v26 = vld [vmem:[%s817_s2] sm:$0x1]  ;;  %v592_v40 = vld [vmem:[#allocation8 + $0x8] sm:$0xff]   ;;  %v593_v41 = vld [vmem:[#allocation8] sm:$0xff]  }
  0x3c   :  { %v189_v27 = vpack.c.bf16 %v99_v26, %v99_v26  ;;  %v215_v42 = vld [vmem:[%s819_s4] sm:$0x1]  ;;  %s711_s4 = smov [#allocation10]  }
  0x3d   :  { %v305_v43 = vpack.c.bf16 %v215_v42, %v215_v42  ;;  %v331_v53 = vld [vmem:[%s821_s6] sm:$0x1]  ;;  %s438_s24 = sshll.u32 %s711_s4, 4  ;;  %s439_s24 = int_to_ptr.vmem [resolvable:$true] %s438_s24 }
  0x3e   :  { %505 = vmatpush3.bf16.msra.mxu0 %v572_v3  ;;  %525 = vmatpush3.bf16.msra.mxu1 %v580_v8  ;;  %v191_v29 = vpack.i.b16 %v189_v27, %v189_v27  ;;  %v421_v54 = vpack.c.bf16 %v331_v53, %v331_v53  ;;  %s674_s25 = scalar_lea.vmem %s439_s24, 128  ;;  %p679_p7 = scmp.lt.s32.totalorder %s439_s24, %s439_s24 }
  0x3f   :  { %506 = vmatprep.subr.bf16.mxu0 %v708_v0  ;;  %526 = vmatprep.subr.bf16.mxu1 %v708_v0  ;;  %v307_v44 = vpack.i.b16 %v305_v43, %v305_v43  ;;  %p675_p6 = scmp.ne.s32.totalorder %s439_s24, %s674_s25  ;;  %p680_p8 = scmp.lt.s32.totalorder %s674_s25, %s674_s25 }
  0x40   :  { %v196_v31 = vrot.slane %v191_v29, %v195_v30  ;;  %v423_v55 = vpack.i.b16 %v421_v54, %v421_v54 }
  0x41   :  { %v312_v45 = vrot.slane %v307_v44, %v195_v30  ;;  %p681_p9 = por %p680_p8, %p679_p7 }
  0x42   :  { %507 = vmatpush3.bf16.msra.mxu0 %v573_v5  ;;  %527 = vmatpush3.bf16.msra.mxu1 %v581_v10  ;;  %v428_v56 = vrot.slane %v423_v55, %v195_v30 }
  0x43   :  { %508 = vmatprep.subr.bf16.mxu0 %v708_v0  ;;  %528 = vmatprep.subr.bf16.mxu1 %v708_v0  ;;  %p682_p10 = pnand %p681_p9, %p675_p6 }
  0x46   :  { %509 = vmatpush3.bf16.msra.mxu0 %v574_v7  ;;  %529 = vmatpush3.bf16.msra.mxu1 %v582_v12 }
  0x47   :  { %510 = vmatprep.subr.bf16.mxu0 %v708_v0  ;;  %530 = vmatprep.subr.bf16.mxu1 %v708_v0 }
  0x4a   :  { %511 = vmatpush3.bf16.msra.mxu0 %v575_v9  ;;  %531 = vmatpush3.bf16.msra.mxu1 %v583_v15 }
  0x4b   :  { %512 = vmatprep.subr.bf16.mxu0 %v708_v0  ;;  %532 = vmatprep.subr.bf16.mxu1 %v708_v0 }
  0x4e   :  { %513 = vmatpush3.bf16.msra.mxu0 %v576_v11  ;;  %533 = vmatpush3.bf16.msra.mxu1 %v584_v17 }
  0x4f   :  { %514 = vmatprep.subr.bf16.mxu0 %v708_v0  ;;  %534 = vmatprep.subr.bf16.mxu1 %v708_v0 }
  0x52   :  { %515 = vmatpush3.bf16.msra.mxu0 %v577_v13  ;;  %535 = vmatpush3.bf16.msra.mxu1 %v585_v18 }
  0x53   :  { %540 = vmatprep.subr.bf16.mxu0 %v708_v0 }
  0x55   :  { %517 = vmatmul.mubr.bf16.vlgmr.msra.gmra.mxu0 %v82_v16 }
  0x56   :  { %556 = vmatprep.mubr.msk.bf16.mxu0 %vm709_vm0, %v708_v0  ;;  %541 = vmatpush3.bf16.msra.mxu0 %v586_v19 }
  0x57   :  { %542 = vmatprep.subr.bf16.mxu0 %v708_v0 }
  0x5a   :  { %543 = vmatpush3.bf16.msra.mxu0 %v587_v20 }
  0x5b   :  { %544 = vmatprep.subr.bf16.mxu0 %v708_v0 }
  0x5e   :  { %545 = vmatpush3.bf16.msra.mxu0 %v588_v21 }
  0x5f   :  { %546 = vmatprep.subr.bf16.mxu0 %v708_v0 }
  0x62   :  { %547 = vmatpush3.bf16.msra.mxu0 %v589_v22 }
  0x63   :  { %548 = vmatprep.subr.bf16.mxu0 %v708_v0 }
  0x66   :  { %549 = vmatpush3.bf16.msra.mxu0 %v590_v23 }
  0x67   :  { %550 = vmatprep.subr.bf16.mxu0 %v708_v0 }
  0x6a   :  { %551 = vmatpush3.bf16.msra.mxu0 %v591_v24 }
  0x6b   :  { %552 = vmatprep.subr.bf16.mxu0 %v708_v0 }
  0x6e   :  { %553 = vmatpush3.bf16.msra.mxu0 %v592_v40 }
  0x6f   :  { %554 = vmatprep.subr.bf16.mxu0 %v708_v0 }
  0x72   :  { %555 = vmatpush3.bf16.msra.mxu0 %v593_v41 }
 0x115   :  { %v182_v32 = vpop.f32.mrf.mxu0 }
 0x116   :  { %v188_v33 = vpack.c.bf16 %v182_v32, %v182_v32 }
 0x117   :  { %v518_v34 = vpop.f32.mrf.mxu0 }
 0x118   :  { %v197_v35 = vadd.bf16 %v196_v31, %v188_v33 }
 0x119   :  { %v185_v36 = vpop.f32.mrf.mxu0 }
 0x11a   :  { %v198_v38 = vmax.bf16 %v710_v37, %v197_v35 }
 0x11b   :  { %v519_v39 = vpop.f32.mrf.mxu0 }
 0x11c   :  { %537 = vmatmul.mubr.bf16.vlgmr.msra.gmra.mxu1 %v198_v38 }
 0x1dc   :  { %v298_v46 = vpop.f32.mrf.mxu1 }
 0x1dd   :  { %v304_v47 = vpack.c.bf16 %v298_v46, %v298_v46 }
 0x1de   :  { %v538_v48 = vpop.f32.mrf.mxu1 }
 0x1df   :  { %v313_v49 = vadd.bf16 %v312_v45, %v304_v47 }
 0x1e0   :  { %v301_v50 = vpop.f32.mrf.mxu1 }
 0x1e1   :  { %v314_v51 = vmax.bf16 %v710_v37, %v313_v49 }
 0x1e2   :  { %v539_v52 = vpop.f32.mrf.mxu1 }
 0x1e3   :  { %557 = vmatmul.mubr.bf16.vlgmr.msra.gmra.mxu0 %v314_v51 }
 0x2a3   :  { %v414_v57 = vpop.f32.mrf.mxu0 }
 0x2a4   :  { %v420_v58 = vpack.c.bf16 %v414_v57, %v414_v57 }
 0x2a5   :  { %v558_v59 = vpop.f32.mrf.mxu0 }
 0x2a6   :  { %v429_v60 = vadd.bf16 %v428_v56, %v420_v58 }
 0x2a7   :  { %v417_v61 = vpop.f32.mrf.mxu0 }
 0x2a8   :  { %v430_v62 = vunpack.c.l.bf16 %v429_v60 }
 0x2a9   :  { %v559_v63 = vpop.f32.mrf.mxu0 }
 0x2aa   :  { %431 = vst [vmem:[#allocation10] sm:$0xff] %v430_v62 }
 0x2ab   :  { %685 = shalt.err (!%p682_p10)
}
 0x2ac   :  { %441 = dma.vmem_to_hbm [thread:$0]  %s439_s24, 128, %s822_s7, [#allocation4]  }
 0x2ad   :  { %700 = dma.done.wait [#allocation4], 128  }
 0x2ae   :  { %701 = vsyncadd [#allocation4], 4294967168 }
 0x2af   :  { %445 = vsyncpa [#allocation3], 1 }
 0x2b0   :  { %446 = vsyncpa [#allocation6], 1 }
 0x2b1   :  { %447 = vsyncpa [#allocation9], 1 }
 0x2b2   :  { %448 = vsyncpa [#allocation4], 1 }

</bundles_post_ra>
